<compile_context>
chip_gen: v7x
topology: tpu7x:2x2x1
jax: 0.10.0
libtpu: 0.0.40
codegen_flags: <defaults>
</compile_context>

<pallas_src>
import jax
import jax.numpy as jnp
from jax.experimental import pallas as pl
from jax.experimental.pallas import tpu as pltpu


def _round_up(x, m):
    return (x + m - 1) // m * m


def _choose_tile_b(B, S, AP, out_itemsize, *, cap=4096, vmem_budget=16 << 20):
    """Pick a batch tile: big (amortize per-step overhead), divides B when
    possible (no wrapper pad pass), >=2 steps for v7x dual-TC when feasible."""
    # Double-buffered per-row bytes for the pipelined tiles (state in, out).
    bytes_per_row = 2 * (S * 4 + AP * out_itemsize)
    fit = max(8, (vmem_budget // bytes_per_row) // 8 * 8)
    cap = min(cap, fit)

    if B <= cap:
        if B >= 16 and B % 16 == 0:
            return B // 2           # 2 grid steps -> both v7x TensorCores busy
        return B                    # single block == full array dim (no pad)

    # Largest multiple of 8 <= cap that divides B (avoids padding `state`).
    t = (cap // 8) * 8
    while t >= 8:
        if B % t == 0:
            return t
        t -= 8
    return (cap // 8) * 8           # fallback: B gets padded up (rare)


def _actor_kernel(ma_ref,                      # scalar prefetch (SMEM), (1,) f32
                  x_ref, w1_ref, b1_ref, w2_ref, b2_ref, w3_ref, b3_ref,
                  out_ref):
    max_action = ma_ref[0]
    mxu_dtype = w1_ref.dtype               # bf16 by default (f32 accumulation)

    x = x_ref[...]                         # (TILE_B, S) f32

    # --- mlp: Linear(S,H) -> ReLU -> Linear(H,H) -> ReLU ---
    h1 = jnp.dot(x.astype(mxu_dtype), w1_ref[...],
                 preferred_element_type=jnp.float32) + b1_ref[...]
    h1 = jnp.maximum(h1, 0.0)

    h2 = jnp.dot(h1.astype(mxu_dtype), w2_ref[...],
                 preferred_element_type=jnp.float32) + b2_ref[...]
    h2 = jnp.maximum(h2, 0.0)

    # --- head: Linear(H,A_padded) -> tanh -> scale by max_action ---
    a = jnp.dot(h2.astype(mxu_dtype), w3_ref[...],
                preferred_element_type=jnp.float32) + b3_ref[...]
    out_ref[...] = (max_action * jnp.tanh(a)).astype(out_ref.dtype)


def actor_forward(state, params, max_action, *, tile_b=None,
                  mxu_dtype=jnp.bfloat16, out_dtype=None,
                  return_padded=False):
    """state: (B, S) f32. Returns (B, A) in out_dtype (default: state.dtype)."""
    w1, b1, w2, b2, w3, b3 = params
    B, S = state.shape
    H = w1.shape[1]
    A = w3.shape[1]
    out_dtype = jnp.dtype(out_dtype) if out_dtype is not None else state.dtype

    # --- lane-dense output: pad action dim to a multiple of 128 ------------
    # Zero columns of w3/b3 -> tanh(0)=0, numerically inert, sliced off below.
    AP = _round_up(A, 128)
    if AP != A:
        w3 = jnp.zeros((H, AP), w3.dtype).at[:, :A].set(w3)
        b3 = jnp.zeros((1, AP), b3.dtype).at[:, :A].set(b3)

    # --- batch tile -----------------------------------------------------------
    if tile_b is None:
        tile_b = _choose_tile_b(B, S, AP, jnp.dtype(out_dtype).itemsize)
    else:
        tile_b = B if tile_b >= B else max(8, _round_up(tile_b, 8))

    B_pad = _round_up(B, tile_b)
    if B_pad != B:
        # Rare fallback (huge B with no divisor <= cap): one extra pad pass.
        state = jnp.zeros((B_pad, S), state.dtype).at[:B].set(state)

    # bf16 weights for the MXU; biases / elementwise stay f32.
    w1m = w1.astype(mxu_dtype)
    w2m = w2.astype(mxu_dtype)
    w3m = w3.astype(mxu_dtype)
    b1f = b1.astype(jnp.float32)
    b2f = b2.astype(jnp.float32)
    b3f = b3.astype(jnp.float32)

    ma = jnp.reshape(jnp.asarray(max_action, jnp.float32), (1,))

    grid = (B_pad // tile_b,)

    # Weights / biases: constant block index -> VMEM-resident across the grid.
    def resident(arr):
        nd = arr.ndim
        return pl.BlockSpec(arr.shape, lambda i, ma_ref, _nd=nd: (0,) * _nd)

    out = pl.pallas_call(
        _actor_kernel,
        out_shape=jax.ShapeDtypeStruct((B_pad, AP), out_dtype),
        grid_spec=pltpu.PrefetchScalarGridSpec(
            num_scalar_prefetch=1,
            grid=grid,
            in_specs=[
                pl.BlockSpec((tile_b, S), lambda i, ma_ref: (i, 0)),
                resident(w1m), resident(b1f),
                resident(w2m), resident(b2f),
                resident(w3m), resident(b3f),
            ],
            out_specs=pl.BlockSpec((tile_b, AP), lambda i, ma_ref: (i, 0)),
        ),
        compiler_params=pltpu.CompilerParams(
            dimension_semantics=("parallel",),
            vmem_limit_bytes=32 * 1024 * 1024),
    )(ma, state, w1m, b1f, w2m, b2f, w3m, b3f)

    if return_padded:
        return out                  # (B_pad, AP): consumer slices lazily / fuses
    return out[:B, :A]


def init_params(key, state_dim, action_dim, hidden_size):
    """Deterministic synthetic init (PyTorch-like uniform fan-in scaling)."""
    ks = jax.random.split(key, 6)

    def lin(kw, kb, fan_in, fan_out):
        bound = 1.0 / jnp.sqrt(fan_in)
        w = jax.random.uniform(kw, (fan_in, fan_out), jnp.float32, -bound, bound)
        b = jax.random.uniform(kb, (1, fan_out), jnp.float32, -bound, bound)
        return w, b

    w1, b1 = lin(ks[0], ks[1], state_dim, hidden_size)
    w2, b2 = lin(ks[2], ks[3], hidden_size, hidden_size)
    w3, b3 = lin(ks[4], ks[5], hidden_size, action_dim)
    return (w1, b1, w2, b2, w3, b3)


def actor_ref_f32(state, params, max_action):
    """Pure-f32 reference (module semantics)."""
    w1, b1, w2, b2, w3, b3 = params
    h = jnp.maximum(state @ w1 + b1, 0.0)
    h = jnp.maximum(h @ w2 + b2, 0.0)
    return max_action * jnp.tanh(h @ w3 + b3)


def actor_ref_mxu(state, params, max_action, mxu_dtype=jnp.bfloat16):
    """Reference with the same bf16-at-MXU / f32-accumulate math as the kernel."""
    w1, b1, w2, b2, w3, b3 = params

    def dot(x, w):
        return jnp.dot(x.astype(mxu_dtype), w.astype(mxu_dtype),
                       preferred_element_type=jnp.float32)

    h = jnp.maximum(dot(state, w1) + b1, 0.0)
    h = jnp.maximum(dot(h, w2) + b2, 0.0)
    return max_action * jnp.tanh(dot(h, w3) + b3)


if __name__ == "__main__":
    key = jax.random.PRNGKey(0)
    k_params, k_state, k_state2 = jax.random.split(key, 3)

    batch, state_dim, action_dim, hidden_size = 2, 16, 4, 32
    max_action = 2.0  # action_space.high[0]

    params = init_params(k_params, state_dim, action_dim, hidden_size)
    state = jax.random.normal(k_state, (batch, state_dim), jnp.float32)

    # Small-batch path: single block, no padding of the batch dim.
    out = actor_forward(state, params, max_action)
    out = jax.block_until_ready(out)
    assert out.shape == (batch, action_dim)

    ref_mxu = actor_ref_mxu(state, params, max_action)
    assert jnp.allclose(out, ref_mxu, atol=2e-3, rtol=2e-3)
    ref_f32 = actor_ref_f32(state, params, max_action)
    assert jnp.allclose(out, ref_f32, atol=5e-2, rtol=5e-2)

    # Multi-block path: B=64 -> tile_b=32, grid=(2,) (exercises pipelining and
    # the v7x dual-TC split) with no wrapper-side padding pass.
    batch2 = 64
    state2 = jax.random.normal(k_state2, (batch2, state_dim), jnp.float32)
    out2 = jax.block_until_ready(actor_forward(state2, params, max_action))
    assert out2.shape == (batch2, action_dim)
    ref2 = actor_ref_mxu(state2, params, max_action)
    assert jnp.allclose(out2, ref2, atol=2e-3, rtol=2e-3)

    print("KERNEL_OK")
</pallas_src>

<mosaic_0001>
module attributes {stable_mosaic.version = 11 : i64} {
  func.func @_actor_kernel(%arg0: i32, %arg1: memref<1xf32, #tpu.memory_space<smem>>, %arg2: memref<2x16xf32, #tpu.memory_space<vmem>>, %arg3: memref<16x32xbf16, #tpu.memory_space<vmem>>, %arg4: memref<1x32xf32, #tpu.memory_space<vmem>>, %arg5: memref<32x32xbf16, #tpu.memory_space<vmem>>, %arg6: memref<1x32xf32, #tpu.memory_space<vmem>>, %arg7: memref<32x128xbf16, #tpu.memory_space<vmem>>, %arg8: memref<1x128xf32, #tpu.memory_space<vmem>>, %arg9: memref<2x128xf32, #tpu.memory_space<vmem>>) attributes {dimension_semantics = [#tpu.dimension_semantics<parallel>], iteration_bounds = array<i64: 1>, scalar_prefetch = 1 : i64, scratch_operands = 0 : i64, tpu.core_type = #tpu.core_type<tc>, window_params = [{transform_indices = @transform_0, window_bounds = array<i64: 2, 16>}, {pipeline_mode = #tpu.pipeline_mode<synchronous>, transform_indices = @transform_1, window_bounds = array<i64: 16, 32>}, {pipeline_mode = #tpu.pipeline_mode<synchronous>, transform_indices = @transform_2, window_bounds = array<i64: 1, 32>}, {pipeline_mode = #tpu.pipeline_mode<synchronous>, transform_indices = @transform_3, window_bounds = array<i64: 32, 32>}, {pipeline_mode = #tpu.pipeline_mode<synchronous>, transform_indices = @transform_4, window_bounds = array<i64: 1, 32>}, {pipeline_mode = #tpu.pipeline_mode<synchronous>, transform_indices = @transform_5, window_bounds = array<i64: 32, 128>}, {pipeline_mode = #tpu.pipeline_mode<synchronous>, transform_indices = @transform_6, window_bounds = array<i64: 1, 128>}, {transform_indices = @transform_7, window_bounds = array<i64: 2, 128>}]} {
    %c0 = arith.constant 0 : index
    %0 = memref.load %arg1[%c0] : memref<1xf32, #tpu.memory_space<smem>>
    %c0_0 = arith.constant 0 : index
    %c0_1 = arith.constant 0 : index
    %1 = vector.load %arg2[%c0_0, %c0_1] : memref<2x16xf32, #tpu.memory_space<vmem>>, vector<2x16xf32>
    %2 = arith.truncf %1 : vector<2x16xf32> to vector<2x16xbf16>
    %c0_2 = arith.constant 0 : index
    %c0_3 = arith.constant 0 : index
    %3 = vector.load %arg3[%c0_2, %c0_3] : memref<16x32xbf16, #tpu.memory_space<vmem>>, vector<16x32xbf16>
    %cst = arith.constant dense<0.000000e+00> : vector<2x32xf32>
    %4 = tpu.matmul %2, %3, %cst {dimension_numbers = #tpu.dot_dimension_numbers<[1], [0], [0], [1], [0, 0, 1, 1], [], []>} : vector<2x16xbf16>, vector<16x32xbf16>, vector<2x32xf32> -> vector<2x32xf32>
    %c0_4 = arith.constant 0 : index
    %c0_5 = arith.constant 0 : index
    %5 = vector.load %arg4[%c0_4, %c0_5] : memref<1x32xf32, #tpu.memory_space<vmem>>, vector<1x32xf32>
    %6 = vector.broadcast %5 : vector<1x32xf32> to vector<2x32xf32>
    %7 = arith.addf %4, %6 : vector<2x32xf32>
    %cst_6 = arith.constant 0.000000e+00 : f32
    %8 = vector.broadcast %cst_6 : f32 to vector<2x32xf32>
    %9 = arith.maximumf %7, %8 : vector<2x32xf32>
    %10 = arith.truncf %9 : vector<2x32xf32> to vector<2x32xbf16>
    %c0_7 = arith.constant 0 : index
    %c0_8 = arith.constant 0 : index
    %11 = vector.load %arg5[%c0_7, %c0_8] : memref<32x32xbf16, #tpu.memory_space<vmem>>, vector<32x32xbf16>
    %cst_9 = arith.constant dense<0.000000e+00> : vector<2x32xf32>
    %12 = tpu.matmul %10, %11, %cst_9 {dimension_numbers = #tpu.dot_dimension_numbers<[1], [0], [0], [1], [0, 0, 1, 1], [], []>} : vector<2x32xbf16>, vector<32x32xbf16>, vector<2x32xf32> -> vector<2x32xf32>
    %c0_10 = arith.constant 0 : index
    %c0_11 = arith.constant 0 : index
    %13 = vector.load %arg6[%c0_10, %c0_11] : memref<1x32xf32, #tpu.memory_space<vmem>>, vector<1x32xf32>
    %14 = vector.broadcast %13 : vector<1x32xf32> to vector<2x32xf32>
    %15 = arith.addf %12, %14 : vector<2x32xf32>
    %cst_12 = arith.constant 0.000000e+00 : f32
    %16 = vector.broadcast %cst_12 : f32 to vector<2x32xf32>
    %17 = arith.maximumf %15, %16 : vector<2x32xf32>
    %18 = arith.truncf %17 : vector<2x32xf32> to vector<2x32xbf16>
    %c0_13 = arith.constant 0 : index
    %c0_14 = arith.constant 0 : index
    %19 = vector.load %arg7[%c0_13, %c0_14] : memref<32x128xbf16, #tpu.memory_space<vmem>>, vector<32x128xbf16>
    %cst_15 = arith.constant dense<0.000000e+00> : vector<2x128xf32>
    %20 = tpu.matmul %18, %19, %cst_15 {dimension_numbers = #tpu.dot_dimension_numbers<[1], [0], [0], [1], [0, 0, 1, 1], [], []>} : vector<2x32xbf16>, vector<32x128xbf16>, vector<2x128xf32> -> vector<2x128xf32>
    %c0_16 = arith.constant 0 : index
    %c0_17 = arith.constant 0 : index
    %21 = vector.load %arg8[%c0_16, %c0_17] : memref<1x128xf32, #tpu.memory_space<vmem>>, vector<1x128xf32>
    %22 = vector.broadcast %21 : vector<1x128xf32> to vector<2x128xf32>
    %23 = arith.addf %20, %22 : vector<2x128xf32>
    %24 = math.tanh %23 : vector<2x128xf32>
    %25 = vector.broadcast %0 : f32 to vector<2x128xf32>
    %26 = arith.mulf %25, %24 : vector<2x128xf32>
    %c0_18 = arith.constant 0 : index
    %c0_19 = arith.constant 0 : index
    %27 = vector.load %arg9[%c0_18, %c0_19] : memref<2x128xf32, #tpu.memory_space<vmem>>, vector<2x128xf32>
    tpu.vector_store %arg9[%c0_18, %c0_19], %26 {strides = array<i32>} : memref<2x128xf32, #tpu.memory_space<vmem>>, vector<2x128xf32>,
    return
  }
  func.func @transform_0(%arg0: i32, %arg1: memref<1xf32, #tpu.memory_space<smem>>) -> (i32, i32) {
    %c0_i32 = arith.constant 0 : i32
    %c0_i32_0 = arith.constant 0 : i32
    return %arg0, %c0_i32 : i32, i32
  }
  func.func @transform_1(%arg0: i32, %arg1: memref<1xf32, #tpu.memory_space<smem>>) -> (i32, i32) {
    %c0_i32 = arith.constant 0 : i32
    %c0_i32_0 = arith.constant 0 : i32
    %c0_i32_1 = arith.constant 0 : i32
    return %c0_i32, %c0_i32_0 : i32, i32
  }
  func.func @transform_2(%arg0: i32, %arg1: memref<1xf32, #tpu.memory_space<smem>>) -> (i32, i32) {
    %c0_i32 = arith.constant 0 : i32
    %c0_i32_0 = arith.constant 0 : i32
    %c0_i32_1 = arith.constant 0 : i32
    return %c0_i32, %c0_i32_0 : i32, i32
  }
  func.func @transform_3(%arg0: i32, %arg1: memref<1xf32, #tpu.memory_space<smem>>) -> (i32, i32) {
    %c0_i32 = arith.constant 0 : i32
    %c0_i32_0 = arith.constant 0 : i32
    %c0_i32_1 = arith.constant 0 : i32
    return %c0_i32, %c0_i32_0 : i32, i32
  }
  func.func @transform_4(%arg0: i32, %arg1: memref<1xf32, #tpu.memory_space<smem>>) -> (i32, i32) {
    %c0_i32 = arith.constant 0 : i32
    %c0_i32_0 = arith.constant 0 : i32
    %c0_i32_1 = arith.constant 0 : i32
    return %c0_i32, %c0_i32_0 : i32, i32
  }
  func.func @transform_5(%arg0: i32, %arg1: memref<1xf32, #tpu.memory_space<smem>>) -> (i32, i32) {
    %c0_i32 = arith.constant 0 : i32
    %c0_i32_0 = arith.constant 0 : i32
    %c0_i32_1 = arith.constant 0 : i32
    return %c0_i32, %c0_i32_0 : i32, i32
  }
  func.func @transform_6(%arg0: i32, %arg1: memref<1xf32, #tpu.memory_space<smem>>) -> (i32, i32) {
    %c0_i32 = arith.constant 0 : i32
    %c0_i32_0 = arith.constant 0 : i32
    %c0_i32_1 = arith.constant 0 : i32
    return %c0_i32, %c0_i32_0 : i32, i32
  }
  func.func @transform_7(%arg0: i32, %arg1: memref<1xf32, #tpu.memory_space<smem>>) -> (i32, i32) {
    %c0_i32 = arith.constant 0 : i32
    %c0_i32_0 = arith.constant 0 : i32
    return %arg0, %c0_i32 : i32, i32
  }
}

</mosaic_0001>

<bundles_post_ra>
// kernel: tpu_custom_call.1
= control target key start
LH: loop header
LB: loop body
LE: loop exit
PB: predicated region body
PF: predicated region fallthrough
CT: control target
= control target key end

     0   :  { %14 = vsyncpa [#allocation5], 0  ;;  %s513_s0 = inlined_call_operand.<no memory space> [shape: f32[1], index: 0, kind: input, shape index: {}]   ;;  %s514_s1 = inlined_call_operand.vmem [shape: f32[2,16], index: 1, kind: input, shape index: {}]   ;;  %s515_s2 = inlined_call_operand.hbm [shape: bf16[16,32], index: 2, kind: input, shape index: {}]   ;;  %s516_s3 = inlined_call_operand.vmem [shape: f32[1,32], index: 3, kind: input, shape index: {}]   ;;  %s517_s4 = inlined_call_operand.hbm [shape: bf16[32,32], index: 4, kind: input, shape index: {}]   ;;  %s518_s5 = inlined_call_operand.vmem [shape: f32[1,32], index: 5, kind: input, shape index: {}]   ;;  %s519_s6 = inlined_call_operand.vmem [shape: bf16[32,128], index: 6, kind: input, shape index: {}]   ;;  %s520_s7 = inlined_call_operand.vmem [shape: f32[1,128], index: 7, kind: input, shape index: {}]   ;;  %s521_s8 = inlined_call_operand.hbm [shape: f32[2,128], index: 8, kind: output, shape index: {}]  }
   0x1   :  { %15 = vsyncpa [#allocation8], 0 }
   0x2   :  { %16 = vsyncpa [#allocation6], 0  ;;  %s404_s27 = smov [#allocation4]   ;;  %s332_s9 = scalar_lea.hbm %s515_s2, 128 }
   0x3   :  { %s24_s28 = sshll.u32 %s404_s27, 4  ;;  %p333_p0 = scmp.ne.s32.totalorder %s515_s2, %s332_s9  ;;  %s25_s28 = int_to_ptr.vmem [resolvable:$true] %s24_s28 }
   0x4   :  { %p336_p1 = scmp.lt.u32.totalorder %s332_s9, %s515_s2 }
   0x6   :  { %p338_p2 = pnand %p336_p1, %p333_p0 }
   0x8   :  { %341 = shalt.err (!%p338_p2)
}
   0x9   :  { %s342_s14 = scalar_lea.vmem %s25_s28, 128  ;;  %p347_p4 = scmp.lt.s32.totalorder %s25_s28, %s25_s28 }
   0xa   :  { %p343_p3 = scmp.ne.s32.totalorder %s25_s28, %s342_s14  ;;  %p348_p5 = scmp.lt.s32.totalorder %s342_s14, %s342_s14 }
   0xc   :  { %p349_p6 = por %p348_p5, %p347_p4 }
   0xe   :  { %p350_p7 = pnand %p349_p6, %p343_p3 }
  0x10   :  { %353 = shalt.err (!%p350_p7)
}
  0x11   :  { %s405_s15 = smov 64   ;;  %s406_s16 = smov 4  }
  0x12   :  { %30 = dma.hbm_to_vmem [thread:$0]  %s515_s2, 128, %s25_s28, [#allocation5], %s405_s15, %s405_s15, %s406_s16  }
  0x13   :  { %s407_s19 = smov [#allocation7]   ;;  %s354_s23 = scalar_lea.hbm %s517_s4, 256 }
  0x14   :  { %s38_s20 = sshll.u32 %s407_s19, 4  ;;  %p355_p8 = scmp.ne.s32.totalorder %s517_s4, %s354_s23  ;;  %s39_s20 = int_to_ptr.vmem [resolvable:$true] %s38_s20 }
  0x15   :  { %p358_p9 = scmp.lt.u32.totalorder %s354_s23, %s517_s4 }
  0x17   :  { %p360_p10 = pnand %p358_p9, %p355_p8 }
  0x19   :  { %363 = shalt.err (!%p360_p10)
}
  0x1a   :  { %s364_s29 = scalar_lea.vmem %s39_s20, 256  ;;  %p369_p12 = scmp.lt.s32.totalorder %s39_s20, %s39_s20 }
  0x1b   :  { %p365_p11 = scmp.ne.s32.totalorder %s39_s20, %s364_s29  ;;  %p370_p13 = scmp.lt.s32.totalorder %s364_s29, %s364_s29 }
  0x1d   :  { %p371_p0 = por %p370_p13, %p369_p12 }
  0x1f   :  { %p372_p1 = pnand %p371_p0, %p365_p11 }
  0x21   :  { %375 = shalt.err (!%p372_p1)
}
  0x22   :  { %44 = dma.hbm_to_vmem [thread:$0]  %s517_s4, 256, %s39_s20, [#allocation8], %s405_s15, %s405_s15, %s406_s16  }
  0x23   :  { %398 = dma.done.wait [#allocation5], 128  }
  0x24   :  { %399 = vsyncadd [#allocation5], 4294967168 }
  0x25   :  { %400 = dma.done.wait [#allocation8], 256  }
  0x26   :  { %401 = vsyncadd [#allocation8], 4294967040  ;;  %v408_v0 = vmov 0.0   ;;  %vm409_vm0 = vmmov 0   ;;  %v325_v1 = vld [vmem:[#allocation4] sm:$0xff]   ;;  %vm76_vm1 = vcmask 130048   ;;  %v258_v30 = vstv %s513_s0 }
  0x27   :  { %296 = vmatprep.subr.bf16.mxu0 %v408_v0  ;;  %298 = vmatprep.mubr.msk.bf16.mxu0 %vm409_vm0, %v408_v0  ;;  %v59_v2 = vld [vmem:[%s514_s1] sm:$0x3]  ;;  %v326_v4 = vld [vmem:[#allocation7] sm:$0xff]   ;;  %v327_v5 = vld [vmem:[#allocation7 + $0x8] sm:$0xff]   ;;  %vm145_vm2 = vcmask 261120   ;;  %s410_s17 = smov [#allocation9]  }
  0x28   :  { %302 = vmatprep.subr.bf16.mxu1 %v408_v0  ;;  %306 = vmatprep.mubr.msk.bf16.mxu1 %vm409_vm0, %v408_v0  ;;  %v60_v3 = vpack.c.bf16 %v59_v2, %v59_v2  ;;  %v328_v6 = vld [vmem:[%s519_s6] sm:$0xff]   ;;  %v329_v15 = vld [vmem:[%s519_s6 + $0x8] sm:$0xff]   ;;  %s267_s18 = sshll.u32 %s410_s17, 4  ;;  %s268_s18 = int_to_ptr.vmem [resolvable:$true] %s267_s18 }
  0x29   :  { %297 = vmatpush3.bf16.msra.mxu0 %v325_v1  ;;  %303 = vmatpush3.bf16.msra.mxu1 %v326_v4  ;;  %v277_v7 = vld [vmem:[%s516_s3] ss:$0 sm:$0xff]  ;;  %s376_s19 = scalar_lea.vmem %s268_s18, 32  ;;  %p381_p3 = scmp.lt.s32.totalorder %s268_s18, %s268_s18 }
  0x2a   :  { %310 = vmatprep.subr.bf16.mxu0 %v408_v0  ;;  %304 = vmatprep.subr.bf16.mxu1 %v408_v0  ;;  %v280_v16 = vld [vmem:[%s518_s5] ss:$0 sm:$0xff]  ;;  %p377_p2 = scmp.ne.s32.totalorder %s268_s18, %s376_s19  ;;  %p382_p4 = scmp.lt.s32.totalorder %s376_s19, %s376_s19 }
  0x2b   :  { %v284_v24 = vld [vmem:[%s520_s7] ss:$0 sm:$0xff] }
  0x2c   :  { %299 = vmatmul.mubr.msk.bf16.vlgmr.msra.gmra.mrb[0].mxu0 %vm76_vm1, %v60_v3  ;;  %p383_p5 = por %p382_p4, %p381_p3 }
  0x2d   :  { %314 = vmatprep.mubr.msk.bf16.mxu0 %vm409_vm0, %v408_v0  ;;  %305 = vmatpush3.bf16.msra.mxu1 %v327_v5 }
  0x2e   :  { %311 = vmatpush3.bf16.msra.mxu0 %v328_v6  ;;  %p384_p6 = pnand %p383_p5, %p377_p2 }
  0x2f   :  { %312 = vmatprep.subr.bf16.mxu0 %v408_v0 }
  0x32   :  { %313 = vmatpush3.bf16.msra.mxu0 %v329_v15 }
  0xff   :  { %v114_v8 = vpop.f32.mrb[0].mxu0 }
 0x100   :  { %v115_v9 = vadd.f32 %v277_v7, %v114_v8  ;;  %v300_v10 = vpop.f32.mrb[1].mxu0 }
 0x101   :  { %v117_v11 = vpop.f32.mrb[2].mxu0 }
 0x102   :  { %v120_v12 = vmax.f32 %v115_v9, 0.0  ;;  %v301_v13 = vpop.f32.mrb[3].mxu0 }
 0x104   :  { %v121_v14 = vpack.c.bf16 %v120_v12, %v120_v12 }
 0x106   :  { %307 = vmatmul.mubr.msk.bf16.vlgmr.msra.gmra.mrb[0].mxu1 %vm145_vm2, %v121_v14 }
 0x1d9   :  { %v183_v17 = vpop.f32.mrb[0].mxu1 }
 0x1da   :  { %v184_v18 = vadd.f32 %v280_v16, %v183_v17  ;;  %v308_v19 = vpop.f32.mrb[1].mxu1 }
 0x1db   :  { %v186_v20 = vpop.f32.mrb[2].mxu1 }
 0x1dc   :  { %v189_v21 = vmax.f32 %v184_v18, 0.0  ;;  %v309_v22 = vpop.f32.mrb[3].mxu1 }
 0x1de   :  { %v190_v23 = vpack.c.bf16 %v189_v21, %v189_v21 }
 0x1e0   :  { %315 = vmatmul.mubr.msk.bf16.vlgmr.msra.gmra.mrb[4].mxu0 %vm145_vm2, %v190_v23 }
 0x2b3   :  { %v251_v25 = vpop.f32.mrb[4].mxu0 }
 0x2b4   :  { %v252_v26 = vadd.f32 %v284_v24, %v251_v25  ;;  %v316_v27 = vpop.f32.mrb[5].mxu0 }
 0x2b5   :  { %v254_v28 = vpop.f32.mrb[6].mxu0 }
 0x2b6   :  { %330 = vtanh.f32 %v252_v26  ;;  %v317_v29 = vpop.f32.mrb[7].mxu0 }
 0x2c0   :  { %v331_v31 = vpop.eup %330 }
 0x2c1   :  { %v259_v32 = vmul.f32 %v331_v31, %v258_v30 }
 0x2c3   :  { %260 = vst [vmem:[#allocation9] sm:$0x3] %v259_v32 }
 0x2c4   :  { %387 = shalt.err (!%p384_p6)
}
 0x2c5   :  { %s388_s21 = scalar_lea.hbm %s521_s8, 32 }
 0x2c6   :  { %p389_p7 = scmp.ne.s32.totalorder %s521_s8, %s388_s21  ;;  %p392_p8 = scmp.lt.u32.totalorder %s388_s21, %s521_s8 }
 0x2c8   :  { %p394_p9 = pnand %p392_p8, %p389_p7 }
 0x2ca   :  { %397 = shalt.err (!%p394_p9)
}
 0x2cb   :  { %270 = dma.vmem_to_hbm [thread:$0]  %s268_s18, 32, %s521_s8, [#allocation6]  }
 0x2cc   :  { %402 = dma.done.wait [#allocation6], 32  }
 0x2cd   :  { %403 = vsyncadd [#allocation6], 4294967264 }
 0x2ce   :  { %274 = vsyncpa [#allocation5], 1 }
 0x2cf   :  { %275 = vsyncpa [#allocation8], 1 }
 0x2d0   :  { %276 = vsyncpa [#allocation6], 1 }

</bundles_post_ra>
